<compile_context>
chip_gen: v5e
topology: v5e:2x2
jax: 0.10.0
libtpu: 0.0.40
codegen_flags: <defaults>
</compile_context>

<pallas_src>
import jax
import jax.numpy as jnp
from jax.experimental import pallas as pl
from jax.experimental.pallas import tpu as pltpu


def _round_up(x, m):
    return ((x + m - 1) // m) * m


def _linear_kernel(x_ref, w_ref, b_ref, o_ref, acc_ref):
    # x_ref: (tm, tk)   activation tile
    # w_ref: (tk, tn)   weight tile, already in (K, N) layout -> plain MXU dot
    # b_ref: (1, tn)    f32 bias tile
    # o_ref: (tm, tn)   output tile
    # acc_ref: (tm, tn) f32 accumulator scratch (resident across the K grid axis)
    k = pl.program_id(2)

    partial = jnp.dot(x_ref[...], w_ref[...], preferred_element_type=jnp.float32)

    @pl.when(k == 0)
    def _():
        acc_ref[...] = partial          # first K-step: no zero-fill + reload

    @pl.when(k > 0)
    def _():
        acc_ref[...] += partial

    @pl.when(k == pl.num_programs(2) - 1)
    def _():
        o_ref[...] = (acc_ref[...] + b_ref[...]).astype(o_ref.dtype)


def _vmem_ceiling_bytes():
    # ~85% of physical VMEM: leaves compiler headroom on v7x (64 MiB) while
    # unlocking larger budgets on v5e/v6e (128 MiB).
    try:
        cap = int(getattr(pltpu.get_tpu_info(), "vmem_capacity_bytes",
                          64 * 1024 * 1024))
    except Exception:
        cap = 64 * 1024 * 1024  # conservative fallback (v7x per-TC)
    return max(32 * 1024 * 1024, int(0.85 * cap))


def prepare_hnn_params(weight, bias, *, compute_dtype=None, tn_max=512, tk_max=512,
                       split_n_for_megacore=True):
    """One-time parameter prep (hoisted out of the per-call path).

    weight: (outp, inp)  -- PyTorch nn.Linear layout
    bias:   (outp,)
    Transposes the weight to (K, N), zero-pads both to tile multiples, and
    optionally casts the weight to the MXU compute dtype.
    """
    N, K = weight.shape
    tn = min(tn_max, _round_up(N, 128))
    tk = min(tk_max, _round_up(K, 128))
    # Keep >=2 blocks along the N ("parallel") axis when N allows it, so both
    # v7x TensorCores get work even when the batch fits in a single M tile.
    if split_n_for_megacore and _round_up(N, 128) >= 256 and _round_up(N, tn) // tn == 1:
        tn = _round_up(_round_up(N, 128) // 2, 128)
    Np, Kp = _round_up(N, tn), _round_up(K, tk)

    w_t = weight.T  # (K, N): one-time layout change; no per-tile transpose in-kernel
    if (Kp, Np) != (K, N):
        w_t = jnp.pad(w_t, ((0, Kp - K), (0, Np - N)))
    if compute_dtype is not None:
        w_t = w_t.astype(compute_dtype)

    b_p = bias.astype(jnp.float32)
    if Np != N:
        b_p = jnp.pad(b_p, (0, Np - N))
    b_p = b_p.reshape(1, Np)

    return dict(w=w_t, b=b_p, N=N, K=K, tn=tn, tk=tk, compute_dtype=compute_dtype)


def hnn_forward_prepared(x, prep, *, tm_max=512):
    """y = x @ weight.T + bias with params preprocessed by prepare_hnn_params."""
    B, K = x.shape
    assert K == prep["K"], "input feature dim must match weight"
    w_p, b_p = prep["w"], prep["b"]
    Kp, Np = w_p.shape
    tn, tk = prep["tn"], prep["tk"]
    out_dtype = x.dtype

    compute_dtype = prep["compute_dtype"]
    xc = x if compute_dtype is None else x.astype(compute_dtype)

    sub = 16 if xc.dtype == jnp.bfloat16 else 8
    tm = min(tm_max, _round_up(B, sub))
    Bp = _round_up(B, tm)
    if (Bp, Kp) != (B, K):
        xc = jnp.pad(xc, ((0, Bp - B), (0, Kp - K)))

    gm, gn, gk = Bp // tm, Np // tn, Kp // tk

    x_item = jnp.dtype(xc.dtype).itemsize
    w_item = jnp.dtype(w_p.dtype).itemsize
    o_item = jnp.dtype(out_dtype).itemsize
    # Double-buffered input/output tiles + resident f32 accumulator, 2x headroom.
    vmem_needed = (2 * (tm * tk * x_item + tk * tn * w_item + tn * 4 + tm * tn * o_item)
                   + tm * tn * 4)
    vmem_limit = int(min(max(2 * vmem_needed, 32 * 1024 * 1024), _vmem_ceiling_bytes()))

    cost = pl.CostEstimate(
        flops=2 * Bp * Kp * Np,
        transcendentals=0,
        # Actual HBM traffic including grid re-reads: x is read once per N tile,
        # the weight once per M tile; the output is written once per (i, j) tile.
        bytes_accessed=(Bp * Kp * x_item * gn
                        + Kp * Np * w_item * gm
                        + Np * 4 * gm
                        + Bp * Np * o_item),
    )

    out_p = pl.pallas_call(
        _linear_kernel,
        out_shape=jax.ShapeDtypeStruct((Bp, Np), out_dtype),
        grid_spec=pltpu.PrefetchScalarGridSpec(
            num_scalar_prefetch=0,
            grid=(gm, gn, gk),
            in_specs=[
                pl.BlockSpec((tm, tk), lambda i, j, k: (i, k)),   # x tile
                pl.BlockSpec((tk, tn), lambda i, j, k: (k, j)),   # weight tile (K, N)
                pl.BlockSpec((1, tn), lambda i, j, k: (0, j)),    # bias tile
            ],
            out_specs=pl.BlockSpec((tm, tn), lambda i, j, k: (i, j)),
            scratch_shapes=[pltpu.VMEM((tm, tn), jnp.float32)],
        ),
        compiler_params=pltpu.CompilerParams(
            dimension_semantics=("parallel", "parallel", "arbitrary"),
            vmem_limit_bytes=vmem_limit,
        ),
        cost_estimate=cost,
    )(xc, w_p, b_p)

    return out_p[:B, :prep["N"]]


def hnn_forward(x, weight, bias, *, compute_dtype=None, tm_max=512, tn_max=512, tk_max=512):
    """Convenience one-shot path.  Prefer prepare_hnn_params() once +
    hnn_forward_prepared() per call so the weight transpose/pad is hoisted."""
    prep = prepare_hnn_params(weight, bias, compute_dtype=compute_dtype,
                              tn_max=tn_max, tk_max=tk_max)
    return hnn_forward_prepared(x, prep, tm_max=tm_max)


if __name__ == "__main__":
    key = jax.random.PRNGKey(0)
    keys = jax.random.split(key, 9)

    # --- Case 1: the HNN toy shape (batch=8, inp=32, outp=16), f32 ---
    batch, inp, outp = 8, 32, 16
    bound = 1.0 / (inp ** 0.5)
    weight = jax.random.uniform(keys[0], (outp, inp), jnp.float32, -bound, bound)
    bias = jax.random.uniform(keys[1], (outp,), jnp.float32, -bound, bound)
    x = jax.random.normal(keys[2], (batch, inp), jnp.float32)

    prep = prepare_hnn_params(weight, bias)         # weight transpose/pad hoisted
    y = jax.block_until_ready(hnn_forward_prepared(x, prep))
    y_ref = x @ weight.T + bias
    assert y.shape == (batch, outp)
    assert jnp.allclose(y, y_ref, atol=1e-5, rtol=1e-5)

    # --- Case 2: non-tile-divisible shapes (exercises M/N/K padding) ---
    batch2, inp2, outp2 = 300, 200, 100
    bound2 = 1.0 / (inp2 ** 0.5)
    weight2 = jax.random.uniform(keys[3], (outp2, inp2), jnp.float32, -bound2, bound2)
    bias2 = jax.random.uniform(keys[4], (outp2,), jnp.float32, -bound2, bound2)
    x2 = jax.random.normal(keys[5], (batch2, inp2), jnp.float32)

    y2 = jax.block_until_ready(hnn_forward(x2, weight2, bias2))
    y2_ref = x2 @ weight2.T + bias2
    assert y2.shape == (batch2, outp2)
    assert jnp.allclose(y2, y2_ref, atol=1e-4, rtol=1e-4)

    # --- Case 3: bf16 MXU inputs with f32 accumulation (looser tolerance) ---
    batch3, inp3, outp3 = 64, 256, 384
    bound3 = 1.0 / (inp3 ** 0.5)
    weight3 = jax.random.uniform(keys[6], (outp3, inp3), jnp.float32, -bound3, bound3)
    bias3 = jax.random.uniform(keys[7], (outp3,), jnp.float32, -bound3, bound3)
    x3 = jax.random.normal(keys[8], (batch3, inp3), jnp.float32)

    prep3 = prepare_hnn_params(weight3, bias3, compute_dtype=jnp.bfloat16)
    y3 = jax.block_until_ready(hnn_forward_prepared(x3, prep3))
    y3_ref = x3 @ weight3.T + bias3
    assert y3.shape == (batch3, outp3)
    assert jnp.allclose(y3, y3_ref, atol=3e-2, rtol=3e-2)

    print("KERNEL_OK")
</pallas_src>

<mosaic_0001>
module attributes {stable_mosaic.version = 11 : i64} {
  func.func @_linear_kernel(%arg0: i32, %arg1: i32, %arg2: i32, %arg3: memref<8x128xf32, #tpu.memory_space<vmem>>, %arg4: memref<128x128xf32, #tpu.memory_space<vmem>>, %arg5: memref<1x128xf32, #tpu.memory_space<vmem>>, %arg6: memref<8x128xf32, #tpu.memory_space<vmem>>, %arg7: memref<8x128xf32, #tpu.memory_space<vmem>>) attributes {dimension_semantics = [#tpu.dimension_semantics<parallel>, #tpu.dimension_semantics<parallel>, #tpu.dimension_semantics<arbitrary>], iteration_bounds = array<i64: 1, 1, 1>, scalar_prefetch = 0 : i64, scratch_operands = 1 : i64, tpu.core_type = #tpu.core_type<tc>, window_params = [{transform_indices = @transform_0, window_bounds = array<i64: 8, 128>}, {transform_indices = @transform_1, window_bounds = array<i64: 128, 128>}, {transform_indices = @transform_2, window_bounds = array<i64: 1, 128>}, {transform_indices = @transform_3, window_bounds = array<i64: 8, 128>}]} {
    %c0 = arith.constant 0 : index
    %c0_0 = arith.constant 0 : index
    %0 = vector.load %arg3[%c0, %c0_0] : memref<8x128xf32, #tpu.memory_space<vmem>>, vector<8x128xf32>
    %c0_1 = arith.constant 0 : index
    %c0_2 = arith.constant 0 : index
    %1 = vector.load %arg4[%c0_1, %c0_2] : memref<128x128xf32, #tpu.memory_space<vmem>>, vector<128x128xf32>
    %cst = arith.constant dense<0.000000e+00> : vector<8x128xf32>
    %2 = tpu.matmul %0, %1, %cst {dimension_numbers = #tpu.dot_dimension_numbers<[1], [0], [0], [1], [0, 0, 1, 1], [], []>} : vector<8x128xf32>, vector<128x128xf32>, vector<8x128xf32> -> vector<8x128xf32>
    %c0_i32 = arith.constant 0 : i32
    %3 = arith.cmpi eq, %arg2, %c0_i32 : i32
    %4 = arith.extui %3 : i1 to i32
    %c0_i32_3 = arith.constant 0 : i32
    %5 = arith.cmpi ne, %4, %c0_i32_3 : i32
    scf.if %5 {
      %c0_8 = arith.constant 0 : index
      %c0_9 = arith.constant 0 : index
      %12 = vector.load %arg7[%c0_8, %c0_9] : memref<8x128xf32, #tpu.memory_space<vmem>>, vector<8x128xf32>
      tpu.vector_store %arg7[%c0_8, %c0_9], %2 {strides = array<i32>} : memref<8x128xf32, #tpu.memory_space<vmem>>, vector<8x128xf32>,
    } else {
    }
    %c0_i32_4 = arith.constant 0 : i32
    %6 = arith.cmpi sgt, %arg2, %c0_i32_4 : i32
    %7 = arith.extui %6 : i1 to i32
    %c0_i32_5 = arith.constant 0 : i32
    %8 = arith.cmpi ne, %7, %c0_i32_5 : i32
    scf.if %8 {
      %c0_8 = arith.constant 0 : index
      %c0_9 = arith.constant 0 : index
      %12 = vector.load %arg7[%c0_8, %c0_9] : memref<8x128xf32, #tpu.memory_space<vmem>>, vector<8x128xf32>
      %13 = arith.addf %12, %2 : vector<8x128xf32>
      %c0_10 = arith.constant 0 : index
      %c0_11 = arith.constant 0 : index
      %14 = vector.load %arg7[%c0_10, %c0_11] : memref<8x128xf32, #tpu.memory_space<vmem>>, vector<8x128xf32>
      tpu.vector_store %arg7[%c0_10, %c0_11], %13 {strides = array<i32>} : memref<8x128xf32, #tpu.memory_space<vmem>>, vector<8x128xf32>,
    } else {
    }
    %c0_i32_6 = arith.constant 0 : i32
    %9 = arith.cmpi eq, %arg2, %c0_i32_6 : i32
    %10 = arith.extui %9 : i1 to i32
    %c0_i32_7 = arith.constant 0 : i32
    %11 = arith.cmpi ne, %10, %c0_i32_7 : i32
    scf.if %11 {
      %c0_8 = arith.constant 0 : index
      %c0_9 = arith.constant 0 : index
      %12 = vector.load %arg7[%c0_8, %c0_9] : memref<8x128xf32, #tpu.memory_space<vmem>>, vector<8x128xf32>
      %c0_10 = arith.constant 0 : index
      %c0_11 = arith.constant 0 : index
      %13 = vector.load %arg5[%c0_10, %c0_11] : memref<1x128xf32, #tpu.memory_space<vmem>>, vector<1x128xf32>
      %14 = vector.broadcast %13 : vector<1x128xf32> to vector<8x128xf32>
      %15 = arith.addf %12, %14 : vector<8x128xf32>
      %c0_12 = arith.constant 0 : index
      %c0_13 = arith.constant 0 : index
      %16 = vector.load %arg6[%c0_12, %c0_13] : memref<8x128xf32, #tpu.memory_space<vmem>>, vector<8x128xf32>
      tpu.vector_store %arg6[%c0_12, %c0_13], %15 {strides = array<i32>} : memref<8x128xf32, #tpu.memory_space<vmem>>, vector<8x128xf32>,
    } else {
    }
    return
  }
  func.func @transform_0(%arg0: i32, %arg1: i32, %arg2: i32) -> (i32, i32) {
    %c0_i32 = arith.constant 0 : i32
    return %arg0, %arg2 : i32, i32
  }
  func.func @transform_1(%arg0: i32, %arg1: i32, %arg2: i32) -> (i32, i32) {
    %c0_i32 = arith.constant 0 : i32
    return %arg2, %arg1 : i32, i32
  }
  func.func @transform_2(%arg0: i32, %arg1: i32, %arg2: i32) -> (i32, i32) {
    %c0_i32 = arith.constant 0 : i32
    %c0_i32_0 = arith.constant 0 : i32
    return %c0_i32, %arg1 : i32, i32
  }
  func.func @transform_3(%arg0: i32, %arg1: i32, %arg2: i32) -> (i32, i32) {
    %c0_i32 = arith.constant 0 : i32
    return %arg0, %arg1 : i32, i32
  }
}

</mosaic_0001>

<bundles_post_ra>
// kernel: tpu_custom_call.1
= control target key start
LH: loop header
LB: loop body
LE: loop exit
PB: predicated region body
PF: predicated region fallthrough
CT: control target
= control target key end

     0   :  { %8 = vsyncpa [#allocation4], 0  ;;  %s243_s0 = inlined_call_operand.hbm [shape: f32[8,128], index: 0, kind: input, shape index: {}]   ;;  %s244_s1 = inlined_call_operand.hbm [shape: f32[128,128], index: 1, kind: input, shape index: {}]   ;;  %s245_s2 = inlined_call_operand.vmem [shape: f32[1,128], index: 2, kind: input, shape index: {}]   ;;  %s246_s3 = inlined_call_operand.hbm [shape: f32[8,128], index: 3, kind: output, shape index: {}]  }
   0x1   :  { %9 = vsyncpa [#allocation7], 0 }
   0x2   :  { %10 = vsyncpa [#allocation5], 0  ;;  %s16_s14 = sshll.u32 %s243_s0, 4  ;;  %s206_s15 = smov [#allocation3]   ;;  %s17_s14 = int_to_ptr.hbm [resolvable:$true] %s16_s14 }
   0x3   :  { %s18_s16 = sshll.u32 %s206_s15, 4  ;;  %s26_s19 = sshll.u32 %s244_s1, 4  ;;  %s19_s16 = int_to_ptr.vmem [resolvable:$true] %s18_s16  ;;  %s27_s19 = int_to_ptr.hbm [resolvable:$true] %s26_s19 }
   0x4   :  { %21 = dma.hbm_to_vmem [thread:$0]  %s17_s14, 128, %s19_s16, [#allocation4]  }
   0x5   :  { %s207_s20 = smov [#allocation6]   ;;  %s208_s22 = smov 128  }
   0x6   :  { %s28_s21 = sshll.u32 %s207_s20, 4  ;;  %s209_s23 = smov 8   ;;  %s29_s21 = int_to_ptr.vmem [resolvable:$true] %s28_s21 }
   0x7   :  { %34 = dma.hbm_to_vmem [thread:$0]  %s27_s19, 2048, %s29_s21, [#allocation7], %s208_s22, %s208_s22, %s209_s23  }
   0x8   :  { %200 = dma.done.wait [#allocation4], 128  }
   0x9   :  { %201 = vsyncadd [#allocation4], 4294967168 }
   0xa   :  { %202 = dma.done.wait [#allocation7], 2048  }
   0xb   :  { %203 = vsyncadd [#allocation7], 4294965248  ;;  %v61_v0 = vld [vmem:[#allocation6 + $0x78] sm:$0xff]  ;;  %v60_v1 = vld [vmem:[#allocation6 + $0x70] sm:$0xff]  ;;  %s210_s24 = smov [#allocation8]   ;;  %s111_s28 = sshll.u32 %s246_s3, 4  ;;  %s112_s28 = int_to_ptr.hbm [resolvable:$true] %s111_s28 }
   0xc   :  { %62 = vmatpush.msra.mxu0 %v61_v0  ;;  %v59_v2 = vld [vmem:[#allocation6 + $0x68] sm:$0xff]  ;;  %v58_v3 = vld [vmem:[#allocation6 + $0x60] sm:$0xff]  ;;  %v57_v4 = vld [vmem:[#allocation6 + $0x58] sm:$0xff]  ;;  %s109_s25 = sshll.u32 %s210_s24, 4  ;;  %s110_s25 = int_to_ptr.vmem [resolvable:$true] %s109_s25 }
   0xd   :  { %v56_v5 = vld [vmem:[#allocation6 + $0x50] sm:$0xff]  ;;  %v55_v6 = vld [vmem:[#allocation6 + $0x48] sm:$0xff]  ;;  %v54_v7 = vld [vmem:[#allocation6 + $0x40] sm:$0xff] }
   0xe   :  { %63 = vmatpush.msra.mxu0 %v60_v1  ;;  %v53_v8 = vld [vmem:[#allocation6 + $0x38] sm:$0xff]  ;;  %v52_v9 = vld [vmem:[#allocation6 + $0x30] sm:$0xff]  ;;  %v51_v10 = vld [vmem:[#allocation6 + $0x28] sm:$0xff] }
   0xf   :  { %v50_v11 = vld [vmem:[#allocation6 + $0x20] sm:$0xff]  ;;  %v49_v12 = vld [vmem:[#allocation6 + $0x18] sm:$0xff]  ;;  %v48_v13 = vld [vmem:[#allocation6 + $0x10] sm:$0xff] }
  0x10   :  { %64 = vmatpush.msra.mxu0 %v59_v2  ;;  %v47_v14 = vld [vmem:[#allocation6 + $0x8] sm:$0xff]  ;;  %v46_v15 = vld [vmem:[#allocation6] sm:$0xff]  ;;  %v45_v16 = vld [vmem:[#allocation3] sm:$0xff] }
  0x11   :  { %v127_v17 = vld [vmem:[%s245_s2] ss:$0 sm:$0xff] }
  0x12   :  { %65 = vmatpush.msra.mxu0 %v58_v3 }
  0x14   :  { %66 = vmatpush.msra.mxu0 %v57_v4 }
  0x16   :  { %67 = vmatpush.msra.mxu0 %v56_v5 }
  0x18   :  { %68 = vmatpush.msra.mxu0 %v55_v6 }
  0x1a   :  { %69 = vmatpush.msra.mxu0 %v54_v7 }
  0x1c   :  { %70 = vmatpush.msra.mxu0 %v53_v8 }
  0x1e   :  { %71 = vmatpush.msra.mxu0 %v52_v9 }
  0x20   :  { %72 = vmatpush.msra.mxu0 %v51_v10 }
  0x22   :  { %73 = vmatpush.msra.mxu0 %v50_v11 }
  0x24   :  { %74 = vmatpush.msra.mxu0 %v49_v12 }
  0x26   :  { %75 = vmatpush.msra.mxu0 %v48_v13 }
  0x28   :  { %76 = vmatpush.msra.mxu0 %v47_v14 }
  0x2a   :  { %77 = vmatpush.msra.mxu0 %v46_v15 }
  0x2b   :  { %78 = vmatmul.f32.vlgmr.msra.gmra.mxu0 %v45_v16 }
  0xa8   :  { %v79_v18 = vpop.f32.mrf.mxu0 }
  0xa9   :  { %v102_v19 = vadd.f32 %v127_v17, %v79_v18 }
  0xab   :  { %103 = vst [vmem:[#allocation8] sm:$0xff] %v102_v19 }
  0xac   :  { %114 = dma.vmem_to_hbm [thread:$0]  %s110_s25, 128, %s112_s28, [#allocation5]  }
  0xad   :  { %204 = dma.done.wait [#allocation5], 128  }
  0xae   :  { %205 = vsyncadd [#allocation5], 4294967168 }
  0xaf   :  { %119 = vsyncpa [#allocation4], 1 }
  0xb0   :  { %120 = vsyncpa [#allocation7], 1 }
  0xb1   :  { %121 = vsyncpa [#allocation5], 1 }

</bundles_post_ra>
